<compile_context>
chip_gen: v5e
topology: v5e:2x2
jax: 0.10.0
libtpu: 0.0.40
codegen_flags: <defaults>
</compile_context>

<pallas_src>
import functools

import jax
import jax.numpy as jnp
from jax.experimental import pallas as pl
from jax.experimental.pallas import tpu as pltpu


def _round_up(x, m):
    return ((x + m - 1) // m) * m


def _softplus(z):
    # matches torch.nn.functional.softplus (beta=1, threshold=20)
    return jnp.where(z > 20.0, z, jnp.log1p(jnp.exp(jnp.minimum(z, 20.0))))


def _silu(z, approx):
    # silu(z) = z * sigmoid(z) = z / (1 + exp(-z)): one EUP exp per element,
    # plus an approx vrcp (free EUP slot) on the fast path.
    e = jnp.exp(-z)
    if approx:
        return z * pl.reciprocal(1.0 + e, approx=True)
    return z / (1.0 + e)


def mamba_block_kernel(
    x_ref,                   # (d_model, TM)   input rows, transposed
    g_ref,                   # (d_model, 1)    RMSNorm weight
    w_inD_ref, b_inD_ref,    # (2*d_inner, d_model), (2*d_inner, 1)   [inp_proj | D]
    w_cl_ref, b_cl_ref,      # (d_inner, d_inner),   (d_inner, 1)     conv_linear
    w123_ref, b123_ref,      # (d_inner+2*state, d_inner), (d_inner+2*state, 1)  [fc1|fc2|fc3]
    w_out_ref, b_out_ref,    # (d_model, d_inner),   (d_model, 1)     out_proj
    o_ref,                   # (d_model, TM)
    *, d_inner, state, compute_dtype, approx,
):
    f32 = jnp.float32
    x = x_ref[...].astype(f32)

    # --- RMSNorm over the feature (sublane) axis ---
    ms = jnp.mean(x * x, axis=0, keepdims=True)                       # (1, TM)
    xn = x * jax.lax.rsqrt(ms + 1e-5) * g_ref[...].astype(f32)        # (d_model, TM)

    # --- fused inp_proj + D projection (both consume xn) ---
    zp = jnp.dot(w_inD_ref[...], xn.astype(compute_dtype),
                 preferred_element_type=f32) + b_inD_ref[...]         # (2*d_inner, TM)
    xp = zp[:d_inner]                                                 # inp_proj branch
    zd = zp[d_inner:]                                                 # D residual branch

    # --- silu + conv_linear ---
    xa = _silu(xp, approx)
    xc = jnp.dot(w_cl_ref[...], xa.astype(compute_dtype),
                 preferred_element_type=f32) + b_cl_ref[...]          # (d_inner, TM)

    # --- S6 selective scan (degenerate: h0 == 0 -> y = x * delta * sum_r(C*B)) ---
    z123 = jnp.dot(w123_ref[...], xc.astype(compute_dtype),
                   preferred_element_type=f32) + b123_ref[...]        # (d_inner+2*state, TM)
    delta = _softplus(z123[:d_inner])                                 # (d_inner, TM)
    Bm = z123[d_inner:d_inner + state]                                # (state, TM)
    Cm = z123[d_inner + state:]                                       # (state, TM)
    cb = jnp.sum(Cm * Bm, axis=0, keepdims=True)                      # (1, TM) sublane reduce
    y_ssm = xc * delta * cb

    # --- gated residual + out_proj ---
    comb = _silu(y_ssm, approx) * _silu(zd, approx)
    out = jnp.dot(w_out_ref[...], comb.astype(compute_dtype),
                  preferred_element_type=f32) + b_out_ref[...]        # (d_model, TM)
    o_ref[...] = out.astype(o_ref.dtype)


def mamba_block(x, params, *, tm=512, compute_dtype=jnp.float32):
    """x: (batch, seq, nodes, d_model) float32."""
    b, l, n, d_model = x.shape
    d_inner = params["w_in"].shape[1]
    state = params["w2"].shape[1]
    M = b * l * n

    # Lane-dense layout: rows -> 128-lane axis; pad M up instead of asserting.
    tm_eff = max(128, min(_round_up(tm, 128), _round_up(M, 128)))
    M_pad = _round_up(M, tm_eff)

    xT = x.reshape(M, d_model).T                                      # (d_model, M)
    if M_pad != M:
        xT = jnp.pad(xT, ((0, 0), (0, M_pad - M)))                    # zero cols: no NaN risk

    # Pre-transposed / fused weights (y^T = W^T @ x^T); biases become columns.
    w_inD = jnp.concatenate([params["w_in"], params["wD"]], axis=1).T       # (2*di, dm)
    b_inD = jnp.concatenate([params["b_in"], params["bD"]], axis=1).T       # (2*di, 1)
    w_cl, b_cl = params["w_cl"].T, params["b_cl"].T
    w123 = jnp.concatenate([params["w1"], params["w2"], params["w3"]], axis=1).T  # (di+2*st, di)
    b123 = jnp.concatenate([params["b1"], params["b2"], params["b3"]], axis=1).T
    w_out, b_out = params["w_out"].T, params["b_out"].T
    g = params["g"].T                                                       # (dm, 1)

    if compute_dtype != jnp.float32:
        # bf16 MXU operands (f32 accumulation); also halves weight DMA bytes.
        w_inD, w_cl, w123, w_out = (w.astype(compute_dtype)
                                    for w in (w_inD, w_cl, w123, w_out))

    weights = [g, w_inD, b_inD, w_cl, b_cl, w123, b123, w_out, b_out]

    col_spec = pl.BlockSpec((d_model, tm_eff), lambda i: (0, i))

    def full_spec(a):
        return pl.BlockSpec(a.shape, lambda i: (0, 0))

    kernel = functools.partial(
        mamba_block_kernel, d_inner=d_inner, state=state,
        compute_dtype=compute_dtype, approx=(compute_dtype != jnp.float32))

    # TODO(synk): for production M, size tm_eff so the grid has >=2 "parallel"
    # steps per chip (v7x megacore); the tiny demo problem fills only one tile.
    outT = pl.pallas_call(
        kernel,
        out_shape=jax.ShapeDtypeStruct((d_model, M_pad), x.dtype),
        grid_spec=pltpu.PrefetchScalarGridSpec(
            num_scalar_prefetch=0,
            grid=(M_pad // tm_eff,),
            in_specs=[col_spec] + [full_spec(w) for w in weights],
            out_specs=col_spec,
        ),
        compiler_params=pltpu.CompilerParams(
            dimension_semantics=("parallel",)),
    )(xT, *weights)

    return outT[:, :M].T.reshape(b, l, n, d_model)


def reference(x, p):
    """Plain-JAX reference of the PyTorch forward semantics."""
    xf = x.astype(jnp.float32)
    ms = jnp.mean(xf * xf, axis=-1, keepdims=True)
    xn = xf * jax.lax.rsqrt(ms + 1e-5) * p["g"][0]
    xa = jax.nn.silu(xn @ p["w_in"] + p["b_in"][0])
    xc = xa @ p["w_cl"] + p["b_cl"][0]
    delta = _softplus(xc @ p["w1"] + p["b1"][0])
    Bm = xc @ p["w2"] + p["b2"][0]
    Cm = xc @ p["w3"] + p["b3"][0]
    y = xc * delta * jnp.sum(Cm * Bm, axis=-1, keepdims=True)
    comb = jax.nn.silu(y) * jax.nn.silu(xn @ p["wD"] + p["bD"][0])
    return comb @ p["w_out"] + p["b_out"][0]


def make_params(key, d_model, d_inner, state_size):
    ks = jax.random.split(key, 16)
    norm = lambda k, shape, s: (jax.random.normal(k, shape, jnp.float32) * s)
    return {
        "g": jnp.ones((1, d_model), jnp.float32),                    # RMSNorm weight
        "w_in": norm(ks[0], (d_model, d_inner), 0.1),
        "b_in": norm(ks[1], (1, d_inner), 0.1),
        "w_cl": norm(ks[2], (d_inner, d_inner), 0.1),
        "b_cl": norm(ks[3], (1, d_inner), 0.1),
        "w1": norm(ks[4], (d_inner, d_inner), 0.1),                  # S6.fc1
        "b1": norm(ks[5], (1, d_inner), 0.1),
        "w2": norm(ks[6], (d_inner, state_size), 0.1),               # S6.fc2
        "b2": norm(ks[7], (1, state_size), 0.1),
        "w3": norm(ks[8], (d_inner, state_size), 0.1),               # S6.fc3
        "b3": norm(ks[9], (1, state_size), 0.1),
        "wD": norm(ks[10], (d_model, d_inner), 0.1),                 # D projection
        "bD": norm(ks[11], (1, d_inner), 0.1),
        "w_out": norm(ks[12], (d_inner, d_model), 0.1),
        "b_out": jnp.ones((1, d_model), jnp.float32),                # init.constant_(bias, 1.0)
    }


if __name__ == "__main__":
    # args: batch=2, seq_length=8, num_nodes=4, model_dim=16, inner_dim=32, state_size=8
    batch, seq_len, num_nodes = 2, 8, 4
    d_model, d_inner, state_size = 16, 32, 8

    key = jax.random.PRNGKey(0)
    kx, kp = jax.random.split(key)
    x = jax.random.normal(kx, (batch, seq_len, num_nodes, d_model), jnp.float32)
    params = make_params(kp, d_model, d_inner, state_size)

    ref = reference(x, params)

    # Strict-correctness run (f32 MXU operands).
    out = jax.block_until_ready(mamba_block(x, params))
    assert out.shape == (batch, seq_len, num_nodes, d_model)
    assert jnp.allclose(out, ref, atol=1e-4, rtol=1e-4), "f32 kernel mismatch vs reference"

    # Fast path (v6e/v7x): bf16 MXU operands, f32 accumulation, approx-recip silu.
    out_fast = jax.block_until_ready(
        mamba_block(x, params, compute_dtype=jnp.bfloat16))
    assert jnp.allclose(out_fast, ref, atol=1e-1, rtol=1e-1), "bf16 kernel mismatch vs reference"

    print("KERNEL_OK")
</pallas_src>

<mosaic_0001>
module attributes {stable_mosaic.version = 11 : i64} {
  func.func @mamba_block_kernel(%arg0: i32, %arg1: memref<16x128xf32, #tpu.memory_space<vmem>>, %arg2: memref<16x1xf32, #tpu.memory_space<vmem>>, %arg3: memref<64x16xf32, #tpu.memory_space<vmem>>, %arg4: memref<64x1xf32, #tpu.memory_space<vmem>>, %arg5: memref<32x32xf32, #tpu.memory_space<vmem>>, %arg6: memref<32x1xf32, #tpu.memory_space<vmem>>, %arg7: memref<48x32xf32, #tpu.memory_space<vmem>>, %arg8: memref<48x1xf32, #tpu.memory_space<vmem>>, %arg9: memref<16x32xf32, #tpu.memory_space<vmem>>, %arg10: memref<16x1xf32, #tpu.memory_space<vmem>>, %arg11: memref<16x128xf32, #tpu.memory_space<vmem>>) attributes {dimension_semantics = [#tpu.dimension_semantics<parallel>], iteration_bounds = array<i64: 1>, scalar_prefetch = 0 : i64, scratch_operands = 0 : i64, tpu.core_type = #tpu.core_type<tc>, window_params = [{transform_indices = @transform_0, window_bounds = array<i64: 16, 128>}, {pipeline_mode = #tpu.pipeline_mode<synchronous>, transform_indices = @transform_1, window_bounds = array<i64: 16, 1>}, {pipeline_mode = #tpu.pipeline_mode<synchronous>, transform_indices = @transform_2, window_bounds = array<i64: 64, 16>}, {pipeline_mode = #tpu.pipeline_mode<synchronous>, transform_indices = @transform_3, window_bounds = array<i64: 64, 1>}, {pipeline_mode = #tpu.pipeline_mode<synchronous>, transform_indices = @transform_4, window_bounds = array<i64: 32, 32>}, {pipeline_mode = #tpu.pipeline_mode<synchronous>, transform_indices = @transform_5, window_bounds = array<i64: 32, 1>}, {pipeline_mode = #tpu.pipeline_mode<synchronous>, transform_indices = @transform_6, window_bounds = array<i64: 48, 32>}, {pipeline_mode = #tpu.pipeline_mode<synchronous>, transform_indices = @transform_7, window_bounds = array<i64: 48, 1>}, {pipeline_mode = #tpu.pipeline_mode<synchronous>, transform_indices = @transform_8, window_bounds = array<i64: 16, 32>}, {pipeline_mode = #tpu.pipeline_mode<synchronous>, transform_indices = @transform_9, window_bounds = array<i64: 16, 1>}, {transform_indices = @transform_10, window_bounds = array<i64: 16, 128>}]} {
    %c0 = arith.constant 0 : index
    %c0_0 = arith.constant 0 : index
    %0 = vector.load %arg1[%c0, %c0_0] : memref<16x128xf32, #tpu.memory_space<vmem>>, vector<16x128xf32>
    %1 = arith.mulf %0, %0 : vector<16x128xf32>
    %cst = arith.constant dense<0.000000e+00> : vector<128xf32>
    %2 = vector.multi_reduction <add>, %1, %cst [0] : vector<16x128xf32> to vector<128xf32>
    %3 = vector.shape_cast %2 : vector<128xf32> to vector<1x128xf32>
    %cst_1 = arith.constant 1.600000e+01 : f32
    %4 = vector.broadcast %cst_1 : f32 to vector<1x128xf32>
    %5 = arith.divf %3, %4 : vector<1x128xf32>
    %cst_2 = arith.constant 9.99999974E-6 : f32
    %6 = vector.broadcast %cst_2 : f32 to vector<1x128xf32>
    %7 = arith.addf %5, %6 : vector<1x128xf32>
    %8 = math.rsqrt %7 : vector<1x128xf32>
    %9 = vector.broadcast %8 : vector<1x128xf32> to vector<16x128xf32>
    %10 = arith.mulf %0, %9 : vector<16x128xf32>
    %c0_3 = arith.constant 0 : index
    %c0_4 = arith.constant 0 : index
    %11 = vector.load %arg2[%c0_3, %c0_4] : memref<16x1xf32, #tpu.memory_space<vmem>>, vector<16x1xf32>
    %12 = vector.broadcast %11 : vector<16x1xf32> to vector<16x128xf32>
    %13 = arith.mulf %10, %12 : vector<16x128xf32>
    %c0_5 = arith.constant 0 : index
    %c0_6 = arith.constant 0 : index
    %14 = vector.load %arg3[%c0_5, %c0_6] : memref<64x16xf32, #tpu.memory_space<vmem>>, vector<64x16xf32>
    %cst_7 = arith.constant dense<0.000000e+00> : vector<64x128xf32>
    %15 = tpu.matmul %14, %13, %cst_7 {dimension_numbers = #tpu.dot_dimension_numbers<[1], [0], [0], [1], [0, 0, 1, 1], [], []>} : vector<64x16xf32>, vector<16x128xf32>, vector<64x128xf32> -> vector<64x128xf32>
    %c0_8 = arith.constant 0 : index
    %c0_9 = arith.constant 0 : index
    %16 = vector.load %arg4[%c0_8, %c0_9] : memref<64x1xf32, #tpu.memory_space<vmem>>, vector<64x1xf32>
    %17 = vector.broadcast %16 : vector<64x1xf32> to vector<64x128xf32>
    %18 = arith.addf %15, %17 : vector<64x128xf32>
    %19 = vector.extract_strided_slice %18 {offsets = [0, 0], sizes = [32, 128], strides = [1, 1]} : vector<64x128xf32> to vector<32x128xf32>
    %20 = vector.extract_strided_slice %18 {offsets = [32, 0], sizes = [32, 128], strides = [1, 1]} : vector<64x128xf32> to vector<32x128xf32>
    %cst_10 = arith.constant 0.000000e+00 : f32
    %21 = vector.broadcast %cst_10 : f32 to vector<32x128xf32>
    %22 = arith.subf %21, %19 : vector<32x128xf32>
    %23 = math.exp %22 : vector<32x128xf32>
    %cst_11 = arith.constant 1.000000e+00 : f32
    %24 = vector.broadcast %cst_11 : f32 to vector<32x128xf32>
    %25 = arith.addf %24, %23 : vector<32x128xf32>
    %26 = arith.divf %19, %25 : vector<32x128xf32>
    %c0_12 = arith.constant 0 : index
    %c0_13 = arith.constant 0 : index
    %27 = vector.load %arg5[%c0_12, %c0_13] : memref<32x32xf32, #tpu.memory_space<vmem>>, vector<32x32xf32>
    %cst_14 = arith.constant dense<0.000000e+00> : vector<32x128xf32>
    %28 = tpu.matmul %27, %26, %cst_14 {dimension_numbers = #tpu.dot_dimension_numbers<[1], [0], [0], [1], [0, 0, 1, 1], [], []>} : vector<32x32xf32>, vector<32x128xf32>, vector<32x128xf32> -> vector<32x128xf32>
    %c0_15 = arith.constant 0 : index
    %c0_16 = arith.constant 0 : index
    %29 = vector.load %arg6[%c0_15, %c0_16] : memref<32x1xf32, #tpu.memory_space<vmem>>, vector<32x1xf32>
    %30 = vector.broadcast %29 : vector<32x1xf32> to vector<32x128xf32>
    %31 = arith.addf %28, %30 : vector<32x128xf32>
    %c0_17 = arith.constant 0 : index
    %c0_18 = arith.constant 0 : index
    %32 = vector.load %arg7[%c0_17, %c0_18] : memref<48x32xf32, #tpu.memory_space<vmem>>, vector<48x32xf32>
    %cst_19 = arith.constant dense<0.000000e+00> : vector<48x128xf32>
    %33 = tpu.matmul %32, %31, %cst_19 {dimension_numbers = #tpu.dot_dimension_numbers<[1], [0], [0], [1], [0, 0, 1, 1], [], []>} : vector<48x32xf32>, vector<32x128xf32>, vector<48x128xf32> -> vector<48x128xf32>
    %c0_20 = arith.constant 0 : index
    %c0_21 = arith.constant 0 : index
    %34 = vector.load %arg8[%c0_20, %c0_21] : memref<48x1xf32, #tpu.memory_space<vmem>>, vector<48x1xf32>
    %35 = vector.broadcast %34 : vector<48x1xf32> to vector<48x128xf32>
    %36 = arith.addf %33, %35 : vector<48x128xf32>
    %37 = vector.extract_strided_slice %36 {offsets = [0, 0], sizes = [32, 128], strides = [1, 1]} : vector<48x128xf32> to vector<32x128xf32>
    %cst_22 = arith.constant 2.000000e+01 : f32
    %38 = vector.broadcast %cst_22 : f32 to vector<32x128xf32>
    %39 = arith.cmpf ogt, %37, %38 : vector<32x128xf32>
    %cst_23 = arith.constant 2.000000e+01 : f32
    %40 = vector.broadcast %cst_23 : f32 to vector<32x128xf32>
    %41 = arith.minimumf %37, %40 : vector<32x128xf32>
    %42 = math.exp %41 : vector<32x128xf32>
    %43 = math.log1p %42 : vector<32x128xf32>
    %44 = arith.select %39, %37, %43 : vector<32x128xi1>, vector<32x128xf32>
    %45 = vector.extract_strided_slice %36 {offsets = [32, 0], sizes = [8, 128], strides = [1, 1]} : vector<48x128xf32> to vector<8x128xf32>
    %46 = vector.extract_strided_slice %36 {offsets = [40, 0], sizes = [8, 128], strides = [1, 1]} : vector<48x128xf32> to vector<8x128xf32>
    %47 = arith.mulf %46, %45 : vector<8x128xf32>
    %cst_24 = arith.constant dense<0.000000e+00> : vector<128xf32>
    %48 = vector.multi_reduction <add>, %47, %cst_24 [0] : vector<8x128xf32> to vector<128xf32>
    %49 = vector.shape_cast %48 : vector<128xf32> to vector<1x128xf32>
    %50 = arith.mulf %31, %44 : vector<32x128xf32>
    %51 = vector.broadcast %49 : vector<1x128xf32> to vector<32x128xf32>
    %52 = arith.mulf %50, %51 : vector<32x128xf32>
    %cst_25 = arith.constant 0.000000e+00 : f32
    %53 = vector.broadcast %cst_25 : f32 to vector<32x128xf32>
    %54 = arith.subf %53, %52 : vector<32x128xf32>
    %55 = math.exp %54 : vector<32x128xf32>
    %cst_26 = arith.constant 1.000000e+00 : f32
    %56 = vector.broadcast %cst_26 : f32 to vector<32x128xf32>
    %57 = arith.addf %56, %55 : vector<32x128xf32>
    %58 = arith.divf %52, %57 : vector<32x128xf32>
    %cst_27 = arith.constant 0.000000e+00 : f32
    %59 = vector.broadcast %cst_27 : f32 to vector<32x128xf32>
    %60 = arith.subf %59, %20 : vector<32x128xf32>
    %61 = math.exp %60 : vector<32x128xf32>
    %cst_28 = arith.constant 1.000000e+00 : f32
    %62 = vector.broadcast %cst_28 : f32 to vector<32x128xf32>
    %63 = arith.addf %62, %61 : vector<32x128xf32>
    %64 = arith.divf %20, %63 : vector<32x128xf32>
    %65 = arith.mulf %58, %64 : vector<32x128xf32>
    %c0_29 = arith.constant 0 : index
    %c0_30 = arith.constant 0 : index
    %66 = vector.load %arg9[%c0_29, %c0_30] : memref<16x32xf32, #tpu.memory_space<vmem>>, vector<16x32xf32>
    %cst_31 = arith.constant dense<0.000000e+00> : vector<16x128xf32>
    %67 = tpu.matmul %66, %65, %cst_31 {dimension_numbers = #tpu.dot_dimension_numbers<[1], [0], [0], [1], [0, 0, 1, 1], [], []>} : vector<16x32xf32>, vector<32x128xf32>, vector<16x128xf32> -> vector<16x128xf32>
    %c0_32 = arith.constant 0 : index
    %c0_33 = arith.constant 0 : index
    %68 = vector.load %arg10[%c0_32, %c0_33] : memref<16x1xf32, #tpu.memory_space<vmem>>, vector<16x1xf32>
    %69 = vector.broadcast %68 : vector<16x1xf32> to vector<16x128xf32>
    %70 = arith.addf %67, %69 : vector<16x128xf32>
    %c0_34 = arith.constant 0 : index
    %c0_35 = arith.constant 0 : index
    %71 = vector.load %arg11[%c0_34, %c0_35] : memref<16x128xf32, #tpu.memory_space<vmem>>, vector<16x128xf32>
    tpu.vector_store %arg11[%c0_34, %c0_35], %70 {strides = array<i32>} : memref<16x128xf32, #tpu.memory_space<vmem>>, vector<16x128xf32>,
    return
  }
  func.func @transform_0(%arg0: i32) -> (i32, i32) {
    %c0_i32 = arith.constant 0 : i32
    %c0_i32_0 = arith.constant 0 : i32
    return %c0_i32, %arg0 : i32, i32
  }
  func.func @transform_1(%arg0: i32) -> (i32, i32) {
    %c0_i32 = arith.constant 0 : i32
    %c0_i32_0 = arith.constant 0 : i32
    %c0_i32_1 = arith.constant 0 : i32
    return %c0_i32, %c0_i32_0 : i32, i32
  }
  func.func @transform_2(%arg0: i32) -> (i32, i32) {
    %c0_i32 = arith.constant 0 : i32
    %c0_i32_0 = arith.constant 0 : i32
    %c0_i32_1 = arith.constant 0 : i32
    return %c0_i32, %c0_i32_0 : i32, i32
  }
  func.func @transform_3(%arg0: i32) -> (i32, i32) {
    %c0_i32 = arith.constant 0 : i32
    %c0_i32_0 = arith.constant 0 : i32
    %c0_i32_1 = arith.constant 0 : i32
    return %c0_i32, %c0_i32_0 : i32, i32
  }
  func.func @transform_4(%arg0: i32) -> (i32, i32) {
    %c0_i32 = arith.constant 0 : i32
    %c0_i32_0 = arith.constant 0 : i32
    %c0_i32_1 = arith.constant 0 : i32
    return %c0_i32, %c0_i32_0 : i32, i32
  }
  func.func @transform_5(%arg0: i32) -> (i32, i32) {
    %c0_i32 = arith.constant 0 : i32
    %c0_i32_0 = arith.constant 0 : i32
    %c0_i32_1 = arith.constant 0 : i32
    return %c0_i32, %c0_i32_0 : i32, i32
  }
  func.func @transform_6(%arg0: i32) -> (i32, i32) {
    %c0_i32 = arith.constant 0 : i32
    %c0_i32_0 = arith.constant 0 : i32
    %c0_i32_1 = arith.constant 0 : i32
    return %c0_i32, %c0_i32_0 : i32, i32
  }
  func.func @transform_7(%arg0: i32) -> (i32, i32) {
    %c0_i32 = arith.constant 0 : i32
    %c0_i32_0 = arith.constant 0 : i32
    %c0_i32_1 = arith.constant 0 : i32
    return %c0_i32, %c0_i32_0 : i32, i32
  }
  func.func @transform_8(%arg0: i32) -> (i32, i32) {
    %c0_i32 = arith.constant 0 : i32
    %c0_i32_0 = arith.constant 0 : i32
    %c0_i32_1 = arith.constant 0 : i32
    return %c0_i32, %c0_i32_0 : i32, i32
  }
  func.func @transform_9(%arg0: i32) -> (i32, i32) {
    %c0_i32 = arith.constant 0 : i32
    %c0_i32_0 = arith.constant 0 : i32
    %c0_i32_1 = arith.constant 0 : i32
    return %c0_i32, %c0_i32_0 : i32, i32
  }
  func.func @transform_10(%arg0: i32) -> (i32, i32) {
    %c0_i32 = arith.constant 0 : i32
    %c0_i32_0 = arith.constant 0 : i32
    return %c0_i32, %arg0 : i32, i32
  }
}

</mosaic_0001>

<bundles_post_ra>
// kernel: tpu_custom_call.1
= control target key start
LH: loop header
LB: loop body
LE: loop exit
PB: predicated region body
PF: predicated region fallthrough
CT: control target
= control target key end

     0   :  { %v863_v1 = vmov 0   ;;  %s1370_s0 = inlined_call_operand.vmem [shape: f32[16,128], index: 0, kind: input, shape index: {}]   ;;  %s1371_s1 = inlined_call_operand.vmem [shape: f32[16,1], index: 1, kind: input, shape index: {}]   ;;  %s1372_s2 = inlined_call_operand.vmem [shape: f32[64,16], index: 2, kind: input, shape index: {}]   ;;  %s1373_s3 = inlined_call_operand.vmem [shape: f32[64,1], index: 3, kind: input, shape index: {}]   ;;  %s1374_s4 = inlined_call_operand.vmem [shape: f32[32,32], index: 4, kind: input, shape index: {}]   ;;  %s1375_s5 = inlined_call_operand.vmem [shape: f32[32,1], index: 5, kind: input, shape index: {}]   ;;  %s1376_s6 = inlined_call_operand.vmem [shape: f32[48,32], index: 6, kind: input, shape index: {}]   ;;  %s1377_s7 = inlined_call_operand.vmem [shape: f32[48,1], index: 7, kind: input, shape index: {}]   ;;  %s1378_s8 = inlined_call_operand.vmem [shape: f32[16,32], index: 8, kind: input, shape index: {}]   ;;  %s1379_s9 = inlined_call_operand.vmem [shape: f32[16,1], index: 9, kind: input, shape index: {}]   ;;  %s1380_s10 = inlined_call_operand.hbm [shape: f32[16,128], index: 10, kind: output, shape index: {}]  }
   0x1   :  { %v69_v0 = vld [vmem:[%s1371_s1 + $0x8] sm:$0xff]  ;;  %766 = vset.pattern.permute.xlu0 %v863_v1  ;;  %767 = vset.pattern.permute.xlu1 %v863_v1 }
   0x2   :  { %15 = vsyncpa [#allocation3], 0  ;;  %77 = vperm.xlu0 %766, %v69_v0   ;;  %768 = vset.pattern.permute.xlu2 %v863_v1  ;;  %v68_v2 = vld [vmem:[%s1371_s1] sm:$0xff]  ;;  %v287_v3 = vld [vmem:[%s1375_s5 + $0x18] sm:$0xff]  ;;  %v864_v12 = vmov 16.0   ;;  %vm138_vm4 = vcmask 130048  }
   0x3   :  { %v284_v4 = vld [vmem:[%s1375_s5] sm:$0xff]  ;;  %v93_v5 = vld [vmem:[%s1373_s3 + $0x18] sm:$0xff]  ;;  %v357_v6 = vld [vmem:[%s1377_s7 + $0x8] sm:$0xff]  ;;  %769 = vrcp.f32 %v864_v12  ;;  %s865_s25 = smov [#allocation2]   ;;  %s723_s28 = sshll.u32 %s1380_s10, 4  ;;  %s724_s28 = int_to_ptr.hbm [resolvable:$true] %s723_s28 }
   0x4   :  { %115 = vperm.xlu1 %767, %v93_v5   ;;  %v361_v7 = vld [vmem:[%s1377_s7 + $0x28] sm:$0xff]  ;;  %v36_v8 = vld [vmem:[%s1370_s0] sm:$0xff]  ;;  %v92_v30 = vld [vmem:[%s1373_s3 + $0x10] sm:$0xff]  ;;  %s721_s26 = sshll.u32 %s865_s25, 4  ;;  %s722_s26 = int_to_ptr.vmem [resolvable:$true] %s721_s26 }
   0x5   :  { %v37_v9 = vld [vmem:[%s1370_s0 + $0x8] sm:$0xff]  ;;  %v38_v10 = vmul.f32 %v36_v8, %v36_v8  ;;  %v286_v33 = vld [vmem:[%s1375_s5 + $0x10] sm:$0xff]  ;;  %v359_v37 = vld [vmem:[%s1377_s7 + $0x18] sm:$0xff] }
   0x6   :  { %v39_v11 = vmul.f32 %v37_v9, %v37_v9  ;;  %v95_v13 = vld [vmem:[%s1373_s3 + $0x28] sm:$0xff]  ;;  %v90_v39 = vld [vmem:[%s1373_s3] sm:$0xff]  ;;  %v97_v46 = vld [vmem:[%s1373_s3 + $0x38] sm:$0xff] }
   0x7   :  { %v675_v19 = vld [vmem:[%s1379_s9 + $0x8] sm:$0xff]  ;;  %v356_v41 = vld [vmem:[%s1377_s7] sm:$0xff]  ;;  %v358_v48 = vld [vmem:[%s1377_s7 + $0x10] sm:$0xff] }
   0x8   :  { %v40_v14 = vadd.f32 %v39_v11, %v38_v10  ;;  %v91_v35 = vld [vmem:[%s1373_s3 + $0x8] sm:$0xff]  ;;  %v94_v51 = vld [vmem:[%s1373_s3 + $0x20] sm:$0xff]  ;;  %v88_v54 = vld [vmem:[%s1372_s2 + $0x30] sm:$0xff] }
   0x9   :  { %v770_v16 = vpop.eup %769  ;;  %105 = vperm.xlu2 %768, %v91_v35   ;;  %v285_v43 = vld [vmem:[%s1375_s5 + $0x8] sm:$0xff]  ;;  %v82_v53 = vld [vmem:[%s1372_s2] sm:$0xff]  ;;  %v89_v57 = vld [vmem:[%s1372_s2 + $0x38] sm:$0xff] }
   0xa   :  { %72 = vperm.xlu0 %766, %v68_v2   ;;  %v41_v15 = vrot.slane %v40_v14, 4  ;;  %v48_v18 = vmul.f32 16.0, %v770_v16  ;;  %vm52_vm0 = vweird.f32 %v770_v16  ;;  %v360_v55 = vld [vmem:[%s1377_s7 + $0x20] sm:$0xff]  ;;  %v83_v56 = vld [vmem:[%s1372_s2 + $0x8] sm:$0xff]  ;;  %v96_v58 = vld [vmem:[%s1373_s3 + $0x30] sm:$0xff] }
   0xb   :  { %v84_v59 = vld [vmem:[%s1372_s2 + $0x10] sm:$0xff]  ;;  %v674_v60 = vld [vmem:[%s1379_s9] sm:$0xff]  ;;  %v85_v61 = vld [vmem:[%s1372_s2 + $0x18] sm:$0xff] }
   0xc   :  { %v42_v17 = vadd.f32 %v41_v15, %v40_v14  ;;  %v49_v21 = vsub.f32 1.0, %v48_v18  ;;  %110 = vperm.xlu1 %767, %v92_v30   ;;  %v86_v62 = vld [vmem:[%s1372_s2 + $0x20] sm:$0xff]  ;;  %v87_v63 = vld [vmem:[%s1372_s2 + $0x28] sm:$0xff]  ;;  %s866_s2 = smov 128  }
   0xe   :  { %v43_v20 = vrot.slane %v42_v17, 2  ;;  %v50_v23 = vmul.f32 %v770_v16, %v49_v21 }
  0x10   :  { %v44_v22 = vadd.f32 %v43_v20, %v42_v17  ;;  %v51_v25 = vadd.f32 %v770_v16, %v50_v23 }
  0x11   :  { %100 = vperm.xlu2 %768, %v90_v39  }
  0x12   :  { %305 = vperm.xlu0 %766, %v287_v3   ;;  %v45_v24 = vrot.slane %v44_v22, 1  ;;  %v53_v27 = vsel %vm52_vm0, %v770_v16, %v51_v25 }
  0x14   :  { %v46_v26 = vadd.f32 %v45_v24, %v44_v22  ;;  %300 = vperm.xlu1 %767, %v286_v33  }
  0x16   :  { %v54_v28 = vmul.f32 %v53_v27, %v46_v26 }
  0x18   :  { %v55_v29 = vadd.f32 1e-05, %v54_v28 }
  0x19   :  { %295 = vperm.xlu2 %768, %v285_v43  }
  0x1a   :  { %290 = vperm.xlu0 %766, %v284_v4   ;;  %771 = vrsqrt.f32 %v55_v29  ;;  %vm62_vm1 = vweird.f32 %v55_v29 }
  0x1c   :  { %379 = vperm.xlu1 %767, %v359_v37  }
  0x20   :  { %v772_v31 = vpop.eup %771 }
  0x21   :  { %v57_v32 = vmul.f32 %v772_v31, %v55_v29  ;;  %vm63_vm2 = vweird.f32 %v772_v31  ;;  %374 = vperm.xlu2 %768, %v358_v48  }
  0x22   :  { %369 = vperm.xlu0 %766, %v357_v6   ;;  %vm64_vm3 = vmor %vm62_vm1, %vm63_vm2 }
  0x23   :  { %v58_v34 = vmul.f32 %v772_v31, %v57_v32 }
  0x24   :  { %364 = vperm.xlu1 %767, %v356_v41  }
  0x25   :  { %v59_v36 = vmul.f32 0.5, %v58_v34 }
  0x27   :  { %v60_v38 = vsub.f32 1.5, %v59_v36 }
  0x29   :  { %v61_v40 = vmul.f32 %v772_v31, %v60_v38  ;;  %384 = vperm.xlu2 %768, %v360_v55  }
  0x2a   :  { %389 = vperm.xlu0 %766, %v361_v7  }
  0x2b   :  { %v65_v42 = vsel %vm64_vm3, %v772_v31, %v61_v40 }
  0x2c   :  { %v67_v44 = vmul.f32 %v65_v42, %v37_v9  ;;  %135 = vperm.xlu1 %767, %v97_v46   ;;  %v66_v49 = vmul.f32 %v65_v42, %v36_v8 }
  0x31   :  { %130 = vperm.xlu2 %768, %v96_v58  }
  0x32   :  { %125 = vperm.xlu0 %766, %v95_v13  }
  0x34   :  { %120 = vperm.xlu1 %767, %v94_v51  }
  0x39   :  { %678 = vperm.xlu2 %768, %v674_v60  }
  0x3a   :  { %683 = vperm.xlu0 %766, %v675_v19  }
  0x63   :  { %v106_v0 = vpop.permute.xlu2 %105 }
  0x6b   :  { %v101_v3 = vpop.permute.xlu2 %100 }
  0x74   :  { %v78_v45 = vpop.permute.xlu0 %77 }
  0x75   :  { %v81_v47 = vmul.f32 %v78_v45, %v67_v44 }
  0x76   :  { %v116_v2 = vpop.permute.xlu1 %115 }
  0x77   :  { %177 = vmatpush.msra.mxu0 %v81_v47  ;;  %755 = vmatpush.msra.mxu3 %v81_v47 }
  0x7c   :  { %v73_v50 = vpop.permute.xlu0 %72 }
  0x7d   :  { %v80_v52 = vmul.f32 %v73_v50, %v66_v49 }
  0x7e   :  { %v111_v11 = vpop.permute.xlu1 %110 }
  0x7f   :  { %178 = vmatpush.msra.mxu0 %v80_v52  ;;  %756 = vmatpush.msra.mxu3 %v80_v52 }
  0x80   :  { %735 = vmatmul.msk.f32.vlgmr.msra.gmra.mxu0 %vm138_vm4, %v82_v53  ;;  %741 = vmatmul.msk.f32.vlgmr.msra.gmra.mxu3 %vm138_vm4, %v88_v54 }
  0x88   :  { %736 = vmatmul.msk.f32.gmra.mxu0 %vm138_vm4, %v83_v56  ;;  %742 = vmatmul.msk.f32.gmra.mxu3 %vm138_vm4, %v89_v57 }
  0x90   :  { %737 = vmatmul.msk.f32.gmra.mxu0 %vm138_vm4, %v84_v59 }
  0x98   :  { %738 = vmatmul.msk.f32.gmra.mxu0 %vm138_vm4, %v85_v61 }
  0xa0   :  { %739 = vmatmul.msk.f32.gmra.mxu0 %vm138_vm4, %v86_v62 }
  0xa8   :  { %740 = vmatmul.msk.f32.gmra.mxu0 %vm138_vm4, %v87_v63 }
  0xfd   :  { %v180_v1 = vpop.f32.mrf.mxu0 }
  0xfe   :  { %v1027_v4 = vadd.f32 %v180_v1, %v101_v3 }
 0x100   :  { %v204_v7 = vsub.f32 0.0, %v1027_v4 }
 0x102   :  { %v208_v10 = vmul.f32 1.442695, %v204_v7 }
 0x105   :  { %v183_v5 = vpop.f32.mrf.mxu0 }
 0x106   :  { %v1029_v6 = vadd.f32 %v183_v5, %v106_v0 }
 0x108   :  { %v205_v8 = vsub.f32 0.0, %v1029_v6 }
 0x10a   :  { %v210_v9 = vmul.f32 1.442695, %v205_v8 }
 0x10c   :  { %773 = vpow2.f32 %v210_v9 }
 0x10d   :  { %v186_v12 = vpop.f32.mrf.mxu0  ;;  %775 = vpow2.f32 %v208_v10 }
 0x10e   :  { %v1033_v13 = vadd.f32 %v186_v12, %v111_v11  ;;  %v280_v11 = vld [vmem:[%s1374_s4] sm:$0xff]  ;;  %v281_v12 = vld [vmem:[%s1374_s4 + $0x8] sm:$0xff] }
 0x110   :  { %v206_v14 = vsub.f32 0.0, %v1033_v13 }
 0x112   :  { %v212_v15 = vmul.f32 1.442695, %v206_v14  ;;  %v774_v16 = vpop.eup %773 }
 0x113   :  { %v776_v18 = vpop.eup %775  ;;  %v1038_v20 = vadd.f32 1.0, %v774_v16  ;;  %v306_v16 = vpop.permute.xlu0 %305 }
 0x114   :  { %777 = vpow2.f32 %v212_v15  ;;  %v1041_v22 = vadd.f32 1.0, %v776_v18 }
 0x115   :  { %v189_v17 = vpop.f32.mrf.mxu0  ;;  %779 = vrcp.f32 %v1038_v20  ;;  %v246_v52 = vand.u32 2147483648, %v1038_v20  ;;  %vm240_vm14 = vweird.f32 %v1038_v20  ;;  %v244_v54 = vand.u32 2147483647, %v1038_v20 }
 0x116   :  { %v1036_v19 = vadd.f32 %v189_v17, %v116_v2  ;;  %vm225_vm5 = vweird.f32 %v1041_v22  ;;  %v231_v59 = vand.u32 2147483648, %v1041_v22  ;;  %v229_v61 = vand.u32 2147483647, %v1041_v22 }
 0x117   :  { %v247_v0 = vor.u32 1.1754944e-38, %v246_v52  ;;  %vm245_vm3 = vcmp.eq.f32.partialorder %v244_v54, 8.507059e+37 }
 0x118   :  { %v207_v21 = vsub.f32 0.0, %v1036_v19  ;;  %v232_v5 = vor.u32 1.1754944e-38, %v231_v59  ;;  %vm230_vm4 = vcmp.eq.f32.partialorder %v229_v61, 8.507059e+37 }
 0x11a   :  { %v778_v23 = vpop.eup %777  ;;  %v214_v24 = vmul.f32 1.442695, %v207_v21  ;;  %v296_v21 = vpop.permute.xlu2 %295 }
 0x11b   :  { %v218_v25 = vadd.f32 1.0, %v778_v23  ;;  %v780_v26 = vpop.eup %779  ;;  %v291_v23 = vpop.permute.xlu0 %290 }
 0x11c   :  { %781 = vpow2.f32 %v214_v24  ;;  %v236_v31 = vmul.f32 %v780_v26, %v1038_v20  ;;  %vm241_vm7 = vweird.f32 %v780_v26 }
 0x11d   :  { %783 = vrcp.f32 %v1041_v22  ;;  %v261_v46 = vand.u32 2147483648, %v218_v25  ;;  %vm255_vm9 = vweird.f32 %v218_v25  ;;  %v259_v48 = vand.u32 2147483647, %v218_v25  ;;  %vm242_vm15 = vmor %vm240_vm14, %vm241_vm7 }
 0x11e   :  { %785 = vrcp.f32 %v218_v25  ;;  %v237_v35 = vsub.f32 1.0, %v236_v31 }
 0x11f   :  { %v262_v58 = vor.u32 1.1754944e-38, %v261_v46  ;;  %vm260_vm1 = vcmp.eq.f32.partialorder %v259_v48, 8.507059e+37 }
 0x120   :  { %v238_v40 = vmul.f32 %v780_v26, %v237_v35 }
 0x122   :  { %v782_v27 = vpop.eup %781  ;;  %v239_v49 = vadd.f32 %v780_v26, %v238_v40 }
 0x123   :  { %v784_v28 = vpop.eup %783  ;;  %v219_v29 = vadd.f32 1.0, %v782_v27  ;;  %v351_v27 = vld [vmem:[%s1376_s6 + $0x8] sm:$0xff] }
 0x124   :  { %v786_v30 = vpop.eup %785  ;;  %v221_v33 = vmul.f32 %v784_v28, %v1041_v22  ;;  %vm226_vm12 = vweird.f32 %v784_v28  ;;  %v243_v60 = vsel %vm242_vm15, %v780_v26, %v239_v49  ;;  %v355_v26 = vld [vmem:[%s1376_s6 + $0x28] sm:$0xff] }
 0x125   :  { %787 = vrcp.f32 %v219_v29  ;;  %v251_v32 = vmul.f32 %v786_v30, %v218_v25  ;;  %vm256_vm6 = vweird.f32 %v786_v30  ;;  %v276_v45 = vand.u32 2147483648, %v219_v29  ;;  %vm227_vm2 = vmor %vm225_vm5, %vm226_vm12  ;;  %v350_v25 = vld [vmem:[%s1376_s6] sm:$0xff] }
 0x126   :  { %v222_v38 = vsub.f32 1.0, %v221_v33  ;;  %v274_v47 = vand.u32 2147483647, %v219_v29  ;;  %vm270_vm10 = vweird.f32 %v219_v29  ;;  %vm1048_vm11 = vmor %vm255_vm9, %vm256_vm6  ;;  %v248_v3 = vsel %vm245_vm3, %v247_v0, %v243_v60  ;;  %v198_v33 = vpop.f32.mrf.mxu3 }
 0x127   :  { %v252_v34 = vsub.f32 1.0, %v251_v32  ;;  %v277_v57 = vor.u32 1.1754944e-38, %v276_v45  ;;  %v249_v9 = vmul.f32 %v248_v3, %v1029_v6  ;;  %vm308_vm5 = vcmask 261120   ;;  %v282_v6 = vld [vmem:[%s1374_s4 + $0x10] sm:$0xff]  ;;  %v375_v32 = vpop.permute.xlu2 %374 }
 0x128   :  { %v223_v43 = vmul.f32 %v784_v28, %v222_v38  ;;  %vm275_vm0 = vcmp.eq.f32.partialorder %v274_v47, 8.507059e+37  ;;  %v370_v38 = vpop.permute.xlu0 %369  ;;  %v192_v47 = vpop.f32.mrf.mxu0 }
 0x129   :  { %v253_v37 = vmul.f32 %v786_v30, %v252_v34 }
 0x12a   :  { %v224_v55 = vadd.f32 %v784_v28, %v223_v43 }
 0x12b   :  { %v788_v36 = vpop.eup %787  ;;  %v254_v42 = vadd.f32 %v786_v30, %v253_v37 }
 0x12c   :  { %v266_v39 = vmul.f32 %v788_v36, %v219_v29  ;;  %vm271_vm8 = vweird.f32 %v788_v36  ;;  %v228_v2 = vsel %vm227_vm2, %v784_v28, %v224_v55  ;;  %v352_v28 = vld [vmem:[%s1376_s6 + $0x10] sm:$0xff]  ;;  %v353_v29 = vld [vmem:[%s1376_s6 + $0x18] sm:$0xff] }
 0x12d   :  { %vm272_vm13 = vmor %vm270_vm10, %vm271_vm8  ;;  %v258_v53 = vsel %vm1048_vm11, %v786_v30, %v254_v42  ;;  %v233_v8 = vsel %vm230_vm4, %v232_v5, %v228_v2  ;;  %v354_v30 = vld [vmem:[%s1376_s6 + $0x20] sm:$0xff] }
 0x12e   :  { %v267_v41 = vsub.f32 1.0, %v266_v39  ;;  %v263_v63 = vsel %vm260_vm1, %v262_v58, %v258_v53  ;;  %v234_v10 = vmul.f32 %v233_v8, %v1027_v4  ;;  %v283_v4 = vld [vmem:[%s1374_s4 + $0x18] sm:$0xff]  ;;  %v201_v40 = vpop.f32.mrf.mxu3 }
 0x12f   :  { %v264_v7 = vmul.f32 %v263_v63, %v1033_v13  ;;  %v385_v37 = vpop.permute.xlu2 %384 }
 0x130   :  { %v268_v44 = vmul.f32 %v788_v36, %v267_v41  ;;  %v195_v61 = vpop.f32.mrf.mxu0 }
 0x132   :  { %v269_v50 = vadd.f32 %v788_v36, %v268_v44 }
 0x134   :  { %v273_v56 = vsel %vm272_vm13, %v788_v36, %v269_v50  ;;  %v390_v50 = vpop.permute.xlu0 %389 }
 0x135   :  { %v278_v62 = vsel %vm275_vm0, %v277_v57, %v273_v56 }
 0x136   :  { %v279_v1 = vmul.f32 %v278_v62, %v1036_v19  ;;  %v301_v19 = vpop.permute.xlu1 %300 }
 0x137   :  { %v131_v48 = vpop.permute.xlu2 %130 }
 0x138   :  { %333 = vmatpush.msra.mxu1 %v279_v1  ;;  %v1132_v52 = vadd.f32 %v198_v33, %v131_v48 }
 0x13a   :  { %334 = vmatpush.msra.mxu1 %v264_v7  ;;  %v594_v58 = vsub.f32 0.0, %v1132_v52 }
 0x13c   :  { %335 = vmatpush.msra.mxu1 %v249_v9  ;;  %v126_v1 = vpop.permute.xlu0 %125  ;;  %v600_v2 = vmul.f32 1.442695, %v594_v58 }
 0x13d   :  { %v1140_v7 = vadd.f32 %v195_v61, %v126_v1 }
 0x13e   :  { %336 = vmatpush.msra.mxu1 %v234_v10  ;;  %v380_v31 = vpop.permute.xlu1 %379 }
 0x13f   :  { %743 = vmatmul.msk.f32.vlgmr.msra.gmra.mxu1 %vm308_vm5, %v280_v11 }
 0x146   :  { %v365_v34 = vpop.permute.xlu1 %364 }
 0x147   :  { %744 = vmatmul.msk.f32.gmra.mxu1 %vm308_vm5, %v281_v12 }
 0x14e   :  { %v136_v42 = vpop.permute.xlu1 %135 }
 0x14f   :  { %745 = vmatmul.msk.f32.gmra.mxu1 %vm308_vm5, %v282_v6  ;;  %v1128_v45 = vadd.f32 %v201_v40, %v136_v42  ;;  %v593_v6 = vsub.f32 0.0, %v1140_v7 }
 0x151   :  { %v595_v51 = vsub.f32 0.0, %v1128_v45 }
 0x153   :  { %v602_v55 = vmul.f32 1.442695, %v595_v51 }
 0x156   :  { %v121_v63 = vpop.permute.xlu1 %120 }
 0x157   :  { %746 = vmatmul.msk.f32.gmra.mxu1 %vm308_vm5, %v283_v4  ;;  %v1138_v3 = vadd.f32 %v192_v47, %v121_v63 }
 0x159   :  { %v592_v11 = vsub.f32 0.0, %v1138_v3 }
 0x1bc   :  { %v338_v13 = vpop.f32.mrf.mxu1 }
 0x1bd   :  { %v1093_v24 = vadd.f32 %v338_v13, %v291_v23  ;;  %v596_v23 = vmul.f32 1.442695, %v592_v11 }
 0x1c4   :  { %v341_v14 = vpop.f32.mrf.mxu1 }
 0x1c5   :  { %v1089_v22 = vadd.f32 %v341_v14, %v296_v21 }
 0x1cc   :  { %v344_v15 = vpop.f32.mrf.mxu1 }
 0x1cd   :  { %v1085_v20 = vadd.f32 %v344_v15, %v301_v19 }
 0x1d4   :  { %v347_v17 = vpop.f32.mrf.mxu1 }
 0x1d5   :  { %v1083_v18 = vadd.f32 %v347_v17, %v306_v16 }
 0x1d7   :  { %422 = vmatpush.msra.mxu2 %v1083_v18  ;;  %757 = vmatpush.msrb.mxu3 %v1083_v18 }
 0x1d9   :  { %423 = vmatpush.msra.mxu2 %v1085_v20  ;;  %758 = vmatpush.msrb.mxu3 %v1085_v20 }
 0x1db   :  { %424 = vmatpush.msra.mxu2 %v1089_v22  ;;  %759 = vmatpush.msrb.mxu3 %v1089_v22 }
 0x1dd   :  { %425 = vmatpush.msra.mxu2 %v1093_v24  ;;  %760 = vmatpush.msrb.mxu3 %v1093_v24 }
 0x1de   :  { %747 = vmatmul.msk.f32.vlgmr.msra.gmra.mxu2 %vm308_vm5, %v350_v25  ;;  %752 = vmatmul.msk.f32.vlgmr.msrb.gmra.mxu3 %vm308_vm5, %v355_v26 }
 0x1e6   :  { %748 = vmatmul.msk.f32.gmra.mxu2 %vm308_vm5, %v351_v27  ;;  %v598_v27 = vmul.f32 1.442695, %v593_v6 }
 0x1ee   :  { %749 = vmatmul.msk.f32.gmra.mxu2 %vm308_vm5, %v352_v28 }
 0x1f6   :  { %750 = vmatmul.msk.f32.gmra.mxu2 %vm308_vm5, %v353_v29 }
 0x1fe   :  { %751 = vmatmul.msk.f32.gmra.mxu2 %vm308_vm5, %v354_v30 }
 0x261   :  { %v427_v35 = vpop.f32.mrf.mxu2  ;;  %v442_v14 = vpop.f32.mrf.mxu3 }
 0x262   :  { %v1123_v36 = vadd.f32 %v427_v35, %v365_v34  ;;  %v443_v29 = vadd.f32 %v442_v14, %v390_v50 }
 0x264   :  { %v449_v39 = vmin.f32 %v1123_v36, 20.0  ;;  %vm445_vm9 = vcmp.gt.f32.partialorder %v1123_v36, 20.0 }
 0x266   :  { %v453_v43 = vmul.f32 1.442695, %v449_v39 }
 0x268   :  { %789 = vpow2.f32 %v453_v43 }
 0x269   :  { %v430_v41 = vpop.f32.mrf.mxu2 }
 0x26a   :  { %v1126_v44 = vadd.f32 %v430_v41, %v370_v38 }
 0x26c   :  { %v450_v46 = vmin.f32 %v1126_v44, 20.0  ;;  %vm446_vm10 = vcmp.gt.f32.partialorder %v1126_v44, 20.0 }
 0x26e   :  { %v455_v49 = vmul.f32 1.442695, %v450_v46  ;;  %v790_v56 = vpop.eup %789 }
 0x26f   :  { %v461_v62 = vadd.f32 1.0, %v790_v56  ;;  %v464_v13 = vmul.f32 -0.5, %v790_v56  ;;  %v467_v28 = vand.u32 2147483647, %v790_v56 }
 0x270   :  { %791 = vpow2.f32 %v455_v49 }
 0x271   :  { %v433_v53 = vpop.f32.mrf.mxu2  ;;  %793 = vpow2.f32 %v602_v55  ;;  %vm1152_vm6 = vcmp.lt.f32.partialorder %v467_v28, 0.0004427343 }
 0x272   :  { %v1134_v54 = vadd.f32 %v433_v53, %v375_v32  ;;  %v465_v32 = vadd.f32 1.0, %v464_v13 }
 0x274   :  { %v451_v57 = vmin.f32 %v1134_v54, 20.0  ;;  %v466_v48 = vmul.f32 %v790_v56, %v465_v32  ;;  %vm447_vm11 = vcmp.gt.f32.partialorder %v1134_v54, 20.0 }
 0x276   :  { %v792_v59 = vpop.eup %791  ;;  %v457_v60 = vmul.f32 1.442695, %v451_v57 }
 0x277   :  { %v470_v0 = vadd.f32 1.0, %v792_v59  ;;  %v794_v10 = vpop.eup %793  ;;  %v473_v15 = vmul.f32 -0.5, %v792_v59  ;;  %v476_v34 = vand.u32 2147483647, %v792_v59 }
 0x278   :  { %795 = vpow2.f32 %v457_v60  ;;  %v1147_v17 = vadd.f32 1.0, %v794_v10 }
 0x279   :  { %v436_v5 = vpop.f32.mrf.mxu2  ;;  %797 = vlog2.f32 %v461_v62  ;;  %v474_v33 = vadd.f32 1.0, %v473_v15  ;;  %vm1156_vm7 = vcmp.lt.f32.partialorder %v476_v34, 0.0004427343 }
 0x27a   :  { %v1142_v8 = vadd.f32 %v436_v5, %v380_v31  ;;  %799 = vlog2.f32 %v470_v0  ;;  %vm658_vm2 = vweird.f32 %v1147_v17  ;;  %v662_v62 = vand.u32 2147483647, %v1147_v17 }
 0x27b   :  { %801 = vpow2.f32 %v600_v2  ;;  %v475_v49 = vmul.f32 %v792_v59, %v474_v33 }
 0x27c   :  { %v452_v9 = vmin.f32 %v1142_v8, 20.0  ;;  %vm448_vm12 = vcmp.gt.f32.partialorder %v1142_v8, 20.0 }
 0x27e   :  { %v796_v12 = vpop.eup %795  ;;  %v459_v4 = vmul.f32 1.442695, %v452_v9 }
 0x27f   :  { %v479_v16 = vadd.f32 1.0, %v796_v12  ;;  %v482_v19 = vmul.f32 -0.5, %v796_v12  ;;  %v798_v21 = vpop.eup %797  ;;  %v485_v41 = vand.u32 2147483647, %v796_v12 }
 0x280   :  { %803 = vpow2.f32 %v459_v4  ;;  %v800_v26 = vpop.eup %799  ;;  %v463_v39 = vmul.f32 0.6931472, %v798_v21 }
 0x281   :  { %805 = vlog2.f32 %v479_v16  ;;  %v439_v25 = vpop.f32.mrf.mxu2  ;;  %v802_v31 = vpop.eup %801  ;;  %v483_v35 = vadd.f32 1.0, %v482_v19  ;;  %v472_v40 = vmul.f32 0.6931472, %v800_v26  ;;  %vm1164_vm8 = vcmp.lt.f32.partialorder %v485_v41, 0.0004427343 }
 0x282   :  { %v440_v30 = vadd.f32 %v439_v25, %v385_v37  ;;  %807 = vrcp.f32 %v1147_v17  ;;  %v1150_v43 = vadd.f32 1.0, %v802_v31  ;;  %v469_v60 = vsel %vm1152_vm6, %v466_v48, %v463_v39 }
 0x283   :  { %809 = vpow2.f32 %v596_v23  ;;  %v484_v55 = vmul.f32 %v796_v12, %v483_v35  ;;  %v478_v61 = vsel %vm1156_vm7, %v475_v49, %v472_v40  ;;  %v497_v2 = vsel %vm445_vm9, %v1123_v36, %v469_v60 }
 0x284   :  { %v501_v38 = vmul.f32 %v443_v29, %v440_v30  ;;  %811 = vpow2.f32 %v598_v27  ;;  %v498_v5 = vsel %vm446_vm10, %v1126_v44, %v478_v61  ;;  %v508_v14 = vmul.f32 %v497_v2, %v1093_v24 }
 0x285   :  { %v509_v15 = vmul.f32 %v498_v5, %v1089_v22  ;;  %vm643_vm14 = vweird.f32 %v1150_v43  ;;  %vm663_vm6 = vcmp.eq.f32.partialorder %v662_v62, 8.507059e+37 }
 0x286   :  { %v804_v42 = vpop.eup %803  ;;  %v502_v37 = vrot.slane %v501_v38, 4 }
 0x287   :  { %v806_v47 = vpop.eup %805  ;;  %v488_v51 = vadd.f32 1.0, %v804_v42  ;;  %v491_v57 = vmul.f32 -0.5, %v804_v42  ;;  %v494_v12 = vand.u32 2147483647, %v804_v42 }
 0x288   :  { %v481_v53 = vmul.f32 0.6931472, %v806_v47  ;;  %v503_v58 = vadd.f32 %v502_v37, %v501_v38  ;;  %v1168_v56 = vpop.eup %807  ;;  %v649_v47 = vand.u32 2147483648, %v1150_v43 }
 0x289   :  { %813 = vlog2.f32 %v488_v51  ;;  %v810_v0 = vpop.eup %809  ;;  %v492_v9 = vadd.f32 1.0, %v491_v57  ;;  %v654_v23 = vmul.f32 %v1168_v56, %v1147_v17  ;;  %vm495_vm13 = vcmp.lt.f32.partialorder %v494_v12, 0.0004427343 }
 0x28a   :  { %815 = vrcp.f32 %v1150_v43  ;;  %v487_v59 = vsel %vm1164_vm8, %v484_v55, %v481_v53  ;;  %v504_v63 = vrot.slane %v503_v58, 2  ;;  %v812_v1 = vpop.eup %811  ;;  %v1179_v13 = vadd.f32 1.0, %v810_v0 }
 0x28b   :  { %v499_v11 = vsel %vm447_vm11, %v1134_v54, %v487_v59  ;;  %v493_v21 = vmul.f32 %v804_v42, %v492_v9  ;;  %v1188_v54 = vadd.f32 1.0, %v812_v1  ;;  %v655_v32 = vsub.f32 1.0, %v654_v23 }
 0x28c   :  { %v505_v10 = vadd.f32 %v504_v63, %v503_v58  ;;  %v510_v19 = vmul.f32 %v499_v11, %v1085_v20  ;;  %817 = vrcp.f32 %v1179_v13  ;;  %vm659_vm0 = vweird.f32 %v1168_v56 }
 0x28d   :  { %819 = vrcp.f32 %v1188_v54  ;;  %v647_v51 = vand.u32 2147483647, %v1150_v43  ;;  %v664_v53 = vand.u32 2147483648, %v1147_v17  ;;  %vm660_vm3 = vmor %vm658_vm2, %vm659_vm0  ;;  %v650_v63 = vor.u32 1.1754944e-38, %v649_v47 }
 0x28e   :  { %v506_v6 = vrot.slane %v505_v10, 1  ;;  %v634_v12 = vand.u32 2147483648, %v1188_v54  ;;  %vm628_vm7 = vweird.f32 %v1188_v54  ;;  %vm613_vm11 = vweird.f32 %v1179_v13 }
 0x28f   :  { %v814_v4 = vpop.eup %813  ;;  %v665_v2 = vor.u32 1.1754944e-38, %v664_v53  ;;  %vm648_vm4 = vcmp.eq.f32.partialorder %v647_v51, 8.507059e+37 }
 0x290   :  { %v1183_v16 = vpop.eup %815  ;;  %v490_v36 = vmul.f32 0.6931472, %v814_v4  ;;  %v507_v44 = vadd.f32 %v506_v6, %v505_v10  ;;  %v1264_v23 = vor.u32 1.1754944e-38, %v634_v12 }
 0x291   :  { %v639_v20 = vmul.f32 %v1183_v16, %v1150_v43  ;;  %vm644_vm15 = vweird.f32 %v1183_v16 }
 0x292   :  { %v496_v25 = vsel %vm495_vm13, %v493_v21, %v490_v36  ;;  %v1191_v26 = vmul.f32 %v510_v19, %v507_v44  ;;  %v1193_v24 = vmul.f32 %v509_v15, %v507_v44  ;;  %v1195_v22 = vmul.f32 %v508_v14, %v507_v44  ;;  %vm1229_vm1 = vmor %vm643_vm14, %vm644_vm15 }
 0x293   :  { %v500_v27 = vsel %vm448_vm12, %v1142_v8, %v496_v25  ;;  %v640_v39 = vsub.f32 1.0, %v639_v20  ;;  %v1209_v8 = vpop.eup %817  ;;  %v617_v19 = vand.u32 2147483647, %v1179_v13  ;;  %v619_v36 = vand.u32 2147483648, %v1179_v13 }
 0x294   :  { %v511_v28 = vmul.f32 %v500_v27, %v1083_v18  ;;  %v518_v29 = vsub.f32 0.0, %v1191_v26  ;;  %v517_v30 = vsub.f32 0.0, %v1193_v24  ;;  %v516_v31 = vsub.f32 0.0, %v1195_v22  ;;  %v1212_v42 = vpop.eup %819 }
 0x295   :  { %v656_v18 = vmul.f32 %v1168_v56, %v655_v32  ;;  %v641_v46 = vmul.f32 %v1183_v16, %v640_v39  ;;  %v609_v49 = vmul.f32 %v1209_v8, %v1179_v13  ;;  %v624_v55 = vmul.f32 %v1212_v42, %v1188_v54  ;;  %v672_v13 = vld [vmem:[%s1378_s8] sm:$0xff] }
 0x296   :  { %v1206_v33 = vmul.f32 %v511_v28, %v507_v44  ;;  %v524_v34 = vmul.f32 1.442695, %v518_v29  ;;  %v522_v35 = vmul.f32 1.442695, %v517_v30  ;;  %v520_v38 = vmul.f32 1.442695, %v516_v31 }
 0x297   :  { %v657_v48 = vadd.f32 %v1168_v56, %v656_v18  ;;  %v642_v60 = vadd.f32 %v1183_v16, %v641_v46  ;;  %v610_v1 = vsub.f32 1.0, %v609_v49  ;;  %v625_v5 = vsub.f32 1.0, %v624_v55 }
 0x298   :  { %v519_v40 = vsub.f32 0.0, %v1206_v33  ;;  %821 = vpow2.f32 %v524_v34  ;;  %v632_v44 = vand.u32 2147483647, %v1188_v54  ;;  %vm614_vm8 = vweird.f32 %v1209_v8 }
 0x299   :  { %823 = vpow2.f32 %v522_v35  ;;  %v661_v0 = vsel %vm660_vm3, %v1168_v56, %v657_v48  ;;  %v646_v17 = vsel %vm1229_vm1, %v1183_v16, %v642_v60  ;;  %v611_v56 = vmul.f32 %v1209_v8, %v610_v1 }
 0x29a   :  { %v526_v41 = vmul.f32 1.442695, %v519_v40  ;;  %825 = vpow2.f32 %v520_v38  ;;  %v666_v11 = vsel %vm663_vm6, %v665_v2, %v661_v0  ;;  %v1251_v4 = vsel %vm648_vm4, %v650_v63, %v646_v17 }
 0x29b   :  { %v626_v14 = vmul.f32 %v1212_v42, %v625_v5  ;;  %v1257_v16 = vmul.f32 %v666_v11, %v1128_v45  ;;  %v1269_v20 = vadd.f32 %v1209_v8, %v611_v56  ;;  %vm629_vm9 = vweird.f32 %v1212_v42 }
 0x29c   :  { %827 = vpow2.f32 %v526_v41  ;;  %vm1284_vm14 = vcmp.eq.f32.partialorder %v632_v44, 8.507059e+37  ;;  %vm1315_vm6 = vmor %vm628_vm7, %vm629_vm9 }
 0x29d   :  { %v627_v29 = vadd.f32 %v1212_v42, %v626_v14 }
 0x29e   :  { %v822_v37 = vpop.eup %821 }
 0x29f   :  { %v824_v50 = vpop.eup %823  ;;  %v1226_v57 = vadd.f32 1.0, %v822_v37  ;;  %v631_v54 = vsel %vm1315_vm6, %v1212_v42, %v627_v29 }
 0x2a0   :  { %v826_v58 = vpop.eup %825  ;;  %v1235_v59 = vadd.f32 1.0, %v824_v50  ;;  %v636_v44 = vsel %vm1284_vm14, %v1264_v23, %v631_v54 }
 0x2a1   :  { %829 = vrcp.f32 %v1226_v57  ;;  %v1242_v10 = vadd.f32 1.0, %v826_v58  ;;  %v571_v27 = vand.u32 2147483647, %v1226_v57  ;;  %vm567_vm10 = vweird.f32 %v1226_v57 }
 0x2a2   :  { %v828_v43 = vpop.eup %827  ;;  %831 = vrcp.f32 %v1235_v59  ;;  %v573_v30 = vand.u32 2147483648, %v1226_v57  ;;  %vm552_vm13 = vweird.f32 %v1235_v59  ;;  %v556_v39 = vand.u32 2147483647, %v1235_v59 }
 0x2a3   :  { %v1240_v9 = vadd.f32 1.0, %v828_v43  ;;  %v558_v40 = vand.u32 2147483648, %v1235_v59  ;;  %vm1288_vm15 = vcmp.eq.f32.partialorder %v571_v27, 8.507059e+37  ;;  %v543_v43 = vand.u32 2147483648, %v1242_v10 }
 0x2a4   :  { %v574_v50 = vor.u32 1.1754944e-38, %v573_v30  ;;  %v541_v1 = vand.u32 2147483647, %v1242_v10  ;;  %vm537_vm7 = vweird.f32 %v1242_v10 }
 0x2a5   :  { %833 = vrcp.f32 %v1240_v9  ;;  %v588_v48 = vand.u32 2147483648, %v1240_v9  ;;  %v586_v58 = vand.u32 2147483647, %v1240_v9 }
 0x2a6   :  { %835 = vrcp.f32 %v1242_v10 }
 0x2a7   :  { %v830_v6 = vpop.eup %829  ;;  %v589_v2 = vor.u32 1.1754944e-38, %v588_v48  ;;  %vm587_vm9 = vcmp.eq.f32.partialorder %v586_v58, 8.507059e+37 }
 0x2a8   :  { %v1254_v15 = vpop.eup %831  ;;  %v563_v21 = vmul.f32 %v830_v6, %v1226_v57  ;;  %vm568_vm12 = vweird.f32 %v830_v6  ;;  %v559_v57 = vor.u32 1.1754944e-38, %v558_v40 }
 0x2a9   :  { %v548_v25 = vmul.f32 %v1254_v15, %v1235_v59  ;;  %vm553_vm0 = vweird.f32 %v1254_v15  ;;  %vm1296_vm1 = vmor %vm567_vm10, %vm568_vm12  ;;  %vm582_vm10 = vweird.f32 %v1240_v9 }
 0x2aa   :  { %v564_v45 = vsub.f32 1.0, %v563_v21  ;;  %vm1306_vm3 = vmor %vm552_vm13, %vm553_vm0  ;;  %vm557_vm13 = vcmp.eq.f32.partialorder %v556_v39, 8.507059e+37  ;;  %v620_v21 = vor.u32 1.1754944e-38, %v619_v36 }
 0x2ab   :  { %v834_v28 = vpop.eup %833  ;;  %v549_v31 = vsub.f32 1.0, %v548_v25 }
 0x2ac   :  { %v836_v32 = vpop.eup %835  ;;  %v578_v34 = vmul.f32 %v834_v28, %v1240_v9  ;;  %v565_v35 = vmul.f32 %v830_v6, %v564_v45  ;;  %vm583_vm2 = vweird.f32 %v834_v28  ;;  %v652_v45 = vmul.f32 %v1251_v4, %v1132_v52  ;;  %v684_v4 = vpop.permute.xlu0 %683 }
 0x2ad   :  { %v550_v38 = vmul.f32 %v1254_v15, %v549_v31  ;;  %v533_v18 = vmul.f32 %v836_v32, %v1242_v10  ;;  %vm538_vm4 = vweird.f32 %v836_v32  ;;  %vm584_vm12 = vmor %vm582_vm10, %vm583_vm2 }
 0x2ae   :  { %v579_v46 = vsub.f32 1.0, %v578_v34  ;;  %v566_v37 = vadd.f32 %v830_v6, %v565_v35  ;;  %vm539_vm0 = vmor %vm537_vm7, %vm538_vm4 }
 0x2af   :  { %v551_v51 = vadd.f32 %v1254_v15, %v550_v38  ;;  %v534_v53 = vsub.f32 1.0, %v533_v18 }
 0x2b0   :  { %v580_v55 = vmul.f32 %v834_v28, %v579_v46  ;;  %v570_v60 = vsel %vm1296_vm1, %v830_v6, %v566_v37  ;;  %vm1335_vm1 = vmor %vm613_vm11, %vm614_vm8  ;;  %v544_v6 = vor.u32 1.1754944e-38, %v543_v43  ;;  %vm618_vm8 = vcmp.eq.f32.partialorder %v617_v19, 8.507059e+37 }
 0x2b1   :  { %v535_v62 = vmul.f32 %v836_v32, %v534_v53  ;;  %v555_v59 = vsel %vm1306_vm3, %v1254_v15, %v551_v51  ;;  %v575_v5 = vsel %vm1288_vm15, %v574_v50, %v570_v60  ;;  %v616_v42 = vsel %vm1335_vm1, %v1209_v8, %v1269_v20 }
 0x2b2   :  { %v581_v0 = vadd.f32 %v834_v28, %v580_v55  ;;  %v560_v56 = vsel %vm557_vm13, %v559_v57, %v555_v59  ;;  %v576_v15 = vmul.f32 %v575_v5, %v1191_v26  ;;  %vm542_vm15 = vcmp.eq.f32.partialorder %v541_v1, 8.507059e+37 }
 0x2b3   :  { %v536_v17 = vadd.f32 %v836_v32, %v535_v62  ;;  %v621_v26 = vsel %vm618_vm8, %v620_v21, %v616_v42  ;;  %v637_v20 = vmul.f32 %v636_v44, %v1140_v7  ;;  %v673_v7 = vld [vmem:[%s1378_s8 + $0x8] sm:$0xff]  ;;  %s867_s8 = smov 8  }
 0x2b4   :  { %v585_v11 = vsel %vm584_vm12, %v834_v28, %v581_v0  ;;  %v670_v36 = vmul.f32 %v652_v45, %v576_v15  ;;  %v622_v23 = vmul.f32 %v621_v26, %v1138_v3 }
 0x2b5   :  { %v590_v12 = vsel %vm587_vm9, %v589_v2, %v585_v11  ;;  %v540_v10 = vsel %vm539_vm0, %v836_v32, %v536_v17 }
 0x2b6   :  { %v591_v14 = vmul.f32 %v590_v12, %v1206_v33  ;;  %v545_v25 = vsel %vm542_vm15, %v544_v6, %v540_v10  ;;  %v561_v33 = vmul.f32 %v560_v56, %v1193_v24  ;;  %v679_v24 = vpop.permute.xlu2 %678 }
 0x2b7   :  { %v546_v27 = vmul.f32 %v545_v25, %v1195_v22 }
 0x2b8   :  { %v671_v8 = vmul.f32 %v1257_v16, %v591_v14  ;;  %v669_v28 = vmul.f32 %v637_v20, %v561_v33 }
 0x2b9   :  { %v668_v52 = vmul.f32 %v622_v23, %v546_v27 }
 0x2ba   :  { %704 = vmatpush.msra.mxu3 %v671_v8 }
 0x2bc   :  { %705 = vmatpush.msra.mxu3 %v670_v36 }
 0x2be   :  { %706 = vmatpush.msra.mxu3 %v669_v28 }
 0x2c0   :  { %707 = vmatpush.msra.mxu3 %v668_v52 }
 0x2c1   :  { %753 = vmatmul.msk.f32.vlgmr.msra.gmra.mxu3 %vm308_vm5, %v672_v13 }
 0x2c9   :  { %754 = vmatmul.msk.f32.gmra.mxu3 %vm308_vm5, %v673_v7 }
 0x344   :  { %v709_v22 = vpop.f32.mrf.mxu3 }
 0x345   :  { %v710_v3 = vadd.f32 %v709_v22, %v679_v24 }
 0x347   :  { %715 = vst [vmem:[#allocation2] sm:$0xff] %v710_v3 }
 0x34c   :  { %v712_v16 = vpop.f32.mrf.mxu3 }
 0x34d   :  { %v713_v19 = vadd.f32 %v712_v16, %v684_v4 }
 0x34f   :  { %716 = vst [vmem:[#allocation2 + $0x8] sm:$0xff] %v713_v19 }
 0x350   :  { %729 = dma.vmem_to_hbm [thread:$0]  %s722_s26, 256, %s724_s28, [#allocation3], %s866_s2, %s866_s2, %s867_s8  }
 0x351   :  { %861 = dma.done.wait [#allocation3], 256  }
 0x352   :  { %862 = vsyncadd [#allocation3], 4294967040 }
 0x353   :  { %734 = vsyncpa [#allocation3], 1 }

</bundles_post_ra>
